<compile_context>
chip_gen: v7x
topology: tpu7x:2x2x1
jax: 0.10.0
libtpu: 0.0.40
codegen_flags: <defaults>
</compile_context>

<pallas_src>
import jax
import jax.numpy as jnp
from jax import lax
from jax.experimental import pallas as pl
from jax.experimental.pallas import tpu as pltpu


# ------------------------------- the kernel ---------------------------------
def _make_kernel(C, H, W, eps=1e-5):
    HW = H * W
    inv_hw = 1.0 / HW
    inv_hw1 = 1.0 / (HW - 1)

    def kernel(x_ref, w_ref, b_ref, ms_ref, mk_ref, o_ref):
        x = x_ref[0]                                  # (C, HW)  lane-dense
        b = b_ref[...]                                # (C, 1)

        # reflection-boundary masks (precomputed 0/1 floats, shared by both convs)
        m_x0 = mk_ref[0] > 0.5                        # columns with x == 0
        m_xw = mk_ref[1] > 0.5                        # columns with x == W-1
        m_y0 = mk_ref[2] > 0.5                        # rows    with y == 0
        m_yh = mk_ref[3] > 0.5                        # rows    with y == H-1

        def lroll(a, s):
            # cyclic lane roll: lroll(a, s)[., p] = a[., p - s]
            return pltpu.roll(a, s % HW, axis=1)

        def conv(h):
            # x-direction reflect shifts: XLU rolls + VPU selects (no MXU)
            hp = lroll(h, 1)                          # h[., p-1]
            hm = lroll(h, -1)                         # h[., p+1]
            g_xm = jnp.where(m_x0, hm, hp)            # kw = 0  (dx = -1)
            g_xp = jnp.where(m_xw, hp, hm)            # kw = 2  (dx = +1)

            acc = jnp.zeros((C, HW), jnp.float32)
            for kw, gx in enumerate((g_xm, h, g_xp)):
                # y-direction reflect shifts of the x-shifted map
                gp = lroll(gx, W)                     # gx[., p-W]
                gm = lroll(gx, -W)                    # gx[., p+W]
                g_ym = jnp.where(m_y0, gm, gp)        # kh = 0  (dy = -1)
                g_yp = jnp.where(m_yh, gp, gm)        # kh = 2  (dy = +1)
                for kh, g in enumerate((g_ym, gx, g_yp)):
                    t = kh * 3 + kw
                    # per-tap channel mix on the MXU: (C,C) @ (C,HW)
                    acc = acc + jnp.dot(w_ref[t], g,
                                        preferred_element_type=jnp.float32)
            return acc + b                            # bias broadcast (C,1)->(C,HW)

        def adain(f, mean, std):
            # single-pass stats: unbiased var = (ssq - sum^2/HW) / (HW-1)
            s1 = jnp.sum(f, axis=-1, keepdims=True)       # (C, 1)
            s2 = jnp.sum(f * f, axis=-1, keepdims=True)   # (C, 1)
            fm = s1 * inv_hw
            var = (s2 - s1 * fm) * inv_hw1 + eps
            return (f - fm) * lax.rsqrt(var) * std + mean

        h = conv(x)
        h = adain(h, ms_ref[0, 0, :, :], ms_ref[0, 1, :, :])   # mean1, std1
        h = jnp.maximum(h, 0.0)
        h = conv(h)
        h = adain(h, ms_ref[0, 2, :, :], ms_ref[0, 3, :, :])   # mean2, std2
        o_ref[0] = h + x                                       # residual add

    return kernel


# ------------------------------ public entry --------------------------------
def res_adain_block(x, mean_std, weight, bias, padding=1):
    """Pallas-TPU implementation of ResAdaINBlock.forward (NCHW, float32)."""
    N, C, H, W = x.shape
    K = weight.shape[-1]
    HW = H * W
    assert weight.shape == (C, C, K, K)
    assert mean_std.shape == (N, 4 * C)
    # kernel is specialized to the module defaults (3x3 conv, reflection pad 1)
    assert K == 3 and padding == 1 and H >= 2 and W >= 2

    x_flat = x.reshape(N, C, HW).astype(jnp.float32)
    # w_taps[kh*K+kw][co, ci] = weight[co, ci, kh, kw]
    w_taps = jnp.transpose(weight, (2, 3, 0, 1)).reshape(K * K, C, C)
    w_taps = w_taps.astype(jnp.float32)
    b_col = bias.reshape(C, 1).astype(jnp.float32)
    # (N, 4, C, 1): [mean1, std1, mean2, std2] per sample, ready to broadcast
    ms = mean_std.reshape(N, 4, C, 1).astype(jnp.float32)

    # reflection-boundary masks, pre-broadcast to (4, C, HW) 0/1 floats
    pos = jnp.arange(HW)
    xw = pos % W
    masks = jnp.stack([(xw == 0), (xw == W - 1),
                       (pos < W), (pos >= HW - W)]).astype(jnp.float32)   # (4, HW)
    masks = jnp.broadcast_to(masks[:, None, :], (4, C, HW))

    kernel = _make_kernel(C, H, W)

    out = pl.pallas_call(
        kernel,
        out_shape=jax.ShapeDtypeStruct((N, C, HW), jnp.float32),
        grid=(N,),
        in_specs=[
            pl.BlockSpec((1, C, HW), lambda n: (n, 0, 0)),        # x (per sample)
            pl.BlockSpec((K * K, C, C), lambda n: (0, 0, 0)),     # tap weights
            pl.BlockSpec((C, 1), lambda n: (0, 0)),               # bias column
            pl.BlockSpec((1, 4, C, 1), lambda n: (n, 0, 0, 0)),   # AdaIN mean/std
            pl.BlockSpec((4, C, HW), lambda n: (0, 0, 0)),        # boundary masks
        ],
        out_specs=pl.BlockSpec((1, C, HW), lambda n: (n, 0, 0)),
        compiler_params=pltpu.CompilerParams(
            dimension_semantics=("parallel",)),
    )(x_flat, w_taps, b_col, ms, masks)

    return out.reshape(N, C, H, W).astype(x.dtype)


# ---------------- pure-JAX reference (mirrors the PyTorch forward) -----------
def _adain_ref(feat, mean, std, eps=1e-5):
    N, C = feat.shape[:2]
    f = feat.reshape(N, C, -1)
    fm = f.mean(axis=2).reshape(N, C, 1, 1)
    fv = f.var(axis=2, ddof=1).reshape(N, C, 1, 1) + eps
    return (feat - fm) / jnp.sqrt(fv) * std.reshape(N, C, 1, 1) + mean.reshape(N, C, 1, 1)


def res_adain_block_ref(x, mean_std, weight, bias, padding=1):
    C = x.shape[1]

    def conv(a):
        ap = jnp.pad(a, ((0, 0), (0, 0), (padding, padding), (padding, padding)),
                     mode="reflect")
        y = lax.conv_general_dilated(ap, weight, (1, 1), "VALID",
                                     dimension_numbers=("NCHW", "OIHW", "NCHW"))
        return y + bias.reshape(1, C, 1, 1)

    out = conv(x)
    out = _adain_ref(out, mean_std[:, :C], mean_std[:, C:2 * C])
    out = jnp.maximum(out, 0.0)
    out = conv(out)
    out = _adain_ref(out, mean_std[:, 2 * C:3 * C], mean_std[:, 3 * C:4 * C])
    return out + x


if __name__ == "__main__":
    key = jax.random.PRNGKey(0)
    kx, km, kw, kb = jax.random.split(key, 4)

    N, C, H, W, K = 2, 4, 16, 16, 3
    x = jax.random.normal(kx, (N, C, H, W), jnp.float32)
    mean_std = jax.random.normal(km, (N, 4 * C), jnp.float32)
    # deterministic synthetic parameters (shapes from nn.Conv2d(dim, dim, 3, 1))
    weight = jax.random.normal(kw, (C, C, K, K), jnp.float32) * (1.0 / (C * K * K) ** 0.5)
    bias = jax.random.normal(kb, (C,), jnp.float32) * 0.1

    fn = jax.jit(res_adain_block)
    out = jax.block_until_ready(fn(x, mean_std, weight, bias))
    ref = jax.block_until_ready(res_adain_block_ref(x, mean_std, weight, bias))

    assert out.shape == x.shape and out.dtype == x.dtype
    err = float(jnp.max(jnp.abs(out - ref)))
    if err > 1e-3:
        raise AssertionError(f"mismatch vs reference: max abs err {err}")
    print("KERNEL_OK")
</pallas_src>

<mosaic_0001>
module attributes {stable_mosaic.version = 11 : i64} {
  func.func @kernel(%arg0: i32, %arg1: memref<1x4x256xf32, #tpu.memory_space<vmem>>, %arg2: memref<9x4x4xf32, #tpu.memory_space<vmem>>, %arg3: memref<4x1xf32, #tpu.memory_space<vmem>>, %arg4: memref<1x4x4x1xf32, #tpu.memory_space<vmem>>, %arg5: memref<4x4x256xf32, #tpu.memory_space<vmem>>, %arg6: memref<1x4x256xf32, #tpu.memory_space<vmem>>) attributes {dimension_semantics = [#tpu.dimension_semantics<parallel>], iteration_bounds = array<i64: 2>, scalar_prefetch = 0 : i64, scratch_operands = 0 : i64, tpu.core_type = #tpu.core_type<tc>, window_params = [{transform_indices = @transform_0, window_bounds = array<i64: 1, 4, 256>}, {pipeline_mode = #tpu.pipeline_mode<synchronous>, transform_indices = @transform_1, window_bounds = array<i64: 9, 4, 4>}, {pipeline_mode = #tpu.pipeline_mode<synchronous>, transform_indices = @transform_2, window_bounds = array<i64: 4, 1>}, {transform_indices = @transform_3, window_bounds = array<i64: 1, 4, 4, 1>}, {pipeline_mode = #tpu.pipeline_mode<synchronous>, transform_indices = @transform_4, window_bounds = array<i64: 4, 4, 256>}, {transform_indices = @transform_5, window_bounds = array<i64: 1, 4, 256>}]} {
    %c0 = arith.constant 0 : index
    %c0_0 = arith.constant 0 : index
    %c0_1 = arith.constant 0 : index
    %0 = vector.load %arg1[%c0, %c0_0, %c0_1] : memref<1x4x256xf32, #tpu.memory_space<vmem>>, vector<1x4x256xf32>
    %1 = vector.shape_cast %0 : vector<1x4x256xf32> to vector<4x256xf32>
    %c0_2 = arith.constant 0 : index
    %c0_3 = arith.constant 0 : index
    %2 = vector.load %arg3[%c0_2, %c0_3] : memref<4x1xf32, #tpu.memory_space<vmem>>, vector<4x1xf32>
    %c0_4 = arith.constant 0 : index
    %c0_5 = arith.constant 0 : index
    %c0_6 = arith.constant 0 : index
    %3 = vector.load %arg5[%c0_4, %c0_5, %c0_6] : memref<4x4x256xf32, #tpu.memory_space<vmem>>, vector<1x4x256xf32>
    %4 = vector.shape_cast %3 : vector<1x4x256xf32> to vector<4x256xf32>
    %cst = arith.constant 5.000000e-01 : f32
    %5 = vector.broadcast %cst : f32 to vector<4x256xf32>
    %6 = arith.cmpf ogt, %4, %5 : vector<4x256xf32>
    %c1 = arith.constant 1 : index
    %c0_7 = arith.constant 0 : index
    %c0_8 = arith.constant 0 : index
    %7 = vector.load %arg5[%c1, %c0_7, %c0_8] : memref<4x4x256xf32, #tpu.memory_space<vmem>>, vector<1x4x256xf32>
    %8 = vector.shape_cast %7 : vector<1x4x256xf32> to vector<4x256xf32>
    %cst_9 = arith.constant 5.000000e-01 : f32
    %9 = vector.broadcast %cst_9 : f32 to vector<4x256xf32>
    %10 = arith.cmpf ogt, %8, %9 : vector<4x256xf32>
    %c2 = arith.constant 2 : index
    %c0_10 = arith.constant 0 : index
    %c0_11 = arith.constant 0 : index
    %11 = vector.load %arg5[%c2, %c0_10, %c0_11] : memref<4x4x256xf32, #tpu.memory_space<vmem>>, vector<1x4x256xf32>
    %12 = vector.shape_cast %11 : vector<1x4x256xf32> to vector<4x256xf32>
    %cst_12 = arith.constant 5.000000e-01 : f32
    %13 = vector.broadcast %cst_12 : f32 to vector<4x256xf32>
    %14 = arith.cmpf ogt, %12, %13 : vector<4x256xf32>
    %c3 = arith.constant 3 : index
    %c0_13 = arith.constant 0 : index
    %c0_14 = arith.constant 0 : index
    %15 = vector.load %arg5[%c3, %c0_13, %c0_14] : memref<4x4x256xf32, #tpu.memory_space<vmem>>, vector<1x4x256xf32>
    %16 = vector.shape_cast %15 : vector<1x4x256xf32> to vector<4x256xf32>
    %cst_15 = arith.constant 5.000000e-01 : f32
    %17 = vector.broadcast %cst_15 : f32 to vector<4x256xf32>
    %18 = arith.cmpf ogt, %16, %17 : vector<4x256xf32>
    %c1_i32 = arith.constant 1 : i32
    %19 = tpu.dynamic_rotate %1 by %c1_i32 dim 1 : vector<4x256xf32>, i32 -> vector<4x256xf32>
    %c255_i32 = arith.constant 255 : i32
    %20 = tpu.dynamic_rotate %1 by %c255_i32 dim 1 : vector<4x256xf32>, i32 -> vector<4x256xf32>
    %21 = arith.select %6, %20, %19 : vector<4x256xi1>, vector<4x256xf32>
    %22 = arith.select %10, %19, %20 : vector<4x256xi1>, vector<4x256xf32>
    %cst_16 = arith.constant 0.000000e+00 : f32
    %23 = vector.broadcast %cst_16 : f32 to vector<4x256xf32>
    %c16_i32 = arith.constant 16 : i32
    %24 = tpu.dynamic_rotate %21 by %c16_i32 dim 1 : vector<4x256xf32>, i32 -> vector<4x256xf32>
    %c240_i32 = arith.constant 240 : i32
    %25 = tpu.dynamic_rotate %21 by %c240_i32 dim 1 : vector<4x256xf32>, i32 -> vector<4x256xf32>
    %26 = arith.select %14, %25, %24 : vector<4x256xi1>, vector<4x256xf32>
    %27 = arith.select %18, %24, %25 : vector<4x256xi1>, vector<4x256xf32>
    %c0_17 = arith.constant 0 : index
    %c0_18 = arith.constant 0 : index
    %c0_19 = arith.constant 0 : index
    %28 = vector.load %arg2[%c0_17, %c0_18, %c0_19] : memref<9x4x4xf32, #tpu.memory_space<vmem>>, vector<1x4x4xf32>
    %29 = vector.shape_cast %28 : vector<1x4x4xf32> to vector<4x4xf32>
    %cst_20 = arith.constant dense<0.000000e+00> : vector<4x256xf32>
    %30 = tpu.matmul %29, %26, %cst_20 {dimension_numbers = #tpu.dot_dimension_numbers<[1], [0], [0], [1], [0, 0, 1, 1], [], []>} : vector<4x4xf32>, vector<4x256xf32>, vector<4x256xf32> -> vector<4x256xf32>
    %31 = arith.addf %23, %30 : vector<4x256xf32>
    %c3_21 = arith.constant 3 : index
    %c0_22 = arith.constant 0 : index
    %c0_23 = arith.constant 0 : index
    %32 = vector.load %arg2[%c3_21, %c0_22, %c0_23] : memref<9x4x4xf32, #tpu.memory_space<vmem>>, vector<1x4x4xf32>
    %33 = vector.shape_cast %32 : vector<1x4x4xf32> to vector<4x4xf32>
    %cst_24 = arith.constant dense<0.000000e+00> : vector<4x256xf32>
    %34 = tpu.matmul %33, %21, %cst_24 {dimension_numbers = #tpu.dot_dimension_numbers<[1], [0], [0], [1], [0, 0, 1, 1], [], []>} : vector<4x4xf32>, vector<4x256xf32>, vector<4x256xf32> -> vector<4x256xf32>
    %35 = arith.addf %31, %34 : vector<4x256xf32>
    %c6 = arith.constant 6 : index
    %c0_25 = arith.constant 0 : index
    %c0_26 = arith.constant 0 : index
    %36 = vector.load %arg2[%c6, %c0_25, %c0_26] : memref<9x4x4xf32, #tpu.memory_space<vmem>>, vector<1x4x4xf32>
    %37 = vector.shape_cast %36 : vector<1x4x4xf32> to vector<4x4xf32>
    %cst_27 = arith.constant dense<0.000000e+00> : vector<4x256xf32>
    %38 = tpu.matmul %37, %27, %cst_27 {dimension_numbers = #tpu.dot_dimension_numbers<[1], [0], [0], [1], [0, 0, 1, 1], [], []>} : vector<4x4xf32>, vector<4x256xf32>, vector<4x256xf32> -> vector<4x256xf32>
    %39 = arith.addf %35, %38 : vector<4x256xf32>
    %c16_i32_28 = arith.constant 16 : i32
    %40 = tpu.dynamic_rotate %1 by %c16_i32_28 dim 1 : vector<4x256xf32>, i32 -> vector<4x256xf32>
    %c240_i32_29 = arith.constant 240 : i32
    %41 = tpu.dynamic_rotate %1 by %c240_i32_29 dim 1 : vector<4x256xf32>, i32 -> vector<4x256xf32>
    %42 = arith.select %14, %41, %40 : vector<4x256xi1>, vector<4x256xf32>
    %43 = arith.select %18, %40, %41 : vector<4x256xi1>, vector<4x256xf32>
    %c1_30 = arith.constant 1 : index
    %c0_31 = arith.constant 0 : index
    %c0_32 = arith.constant 0 : index
    %44 = vector.load %arg2[%c1_30, %c0_31, %c0_32] : memref<9x4x4xf32, #tpu.memory_space<vmem>>, vector<1x4x4xf32>
    %45 = vector.shape_cast %44 : vector<1x4x4xf32> to vector<4x4xf32>
    %cst_33 = arith.constant dense<0.000000e+00> : vector<4x256xf32>
    %46 = tpu.matmul %45, %42, %cst_33 {dimension_numbers = #tpu.dot_dimension_numbers<[1], [0], [0], [1], [0, 0, 1, 1], [], []>} : vector<4x4xf32>, vector<4x256xf32>, vector<4x256xf32> -> vector<4x256xf32>
    %47 = arith.addf %39, %46 : vector<4x256xf32>
    %c4 = arith.constant 4 : index
    %c0_34 = arith.constant 0 : index
    %c0_35 = arith.constant 0 : index
    %48 = vector.load %arg2[%c4, %c0_34, %c0_35] : memref<9x4x4xf32, #tpu.memory_space<vmem>>, vector<1x4x4xf32>
    %49 = vector.shape_cast %48 : vector<1x4x4xf32> to vector<4x4xf32>
    %cst_36 = arith.constant dense<0.000000e+00> : vector<4x256xf32>
    %50 = tpu.matmul %49, %1, %cst_36 {dimension_numbers = #tpu.dot_dimension_numbers<[1], [0], [0], [1], [0, 0, 1, 1], [], []>} : vector<4x4xf32>, vector<4x256xf32>, vector<4x256xf32> -> vector<4x256xf32>
    %51 = arith.addf %47, %50 : vector<4x256xf32>
    %c7 = arith.constant 7 : index
    %c0_37 = arith.constant 0 : index
    %c0_38 = arith.constant 0 : index
    %52 = vector.load %arg2[%c7, %c0_37, %c0_38] : memref<9x4x4xf32, #tpu.memory_space<vmem>>, vector<1x4x4xf32>
    %53 = vector.shape_cast %52 : vector<1x4x4xf32> to vector<4x4xf32>
    %cst_39 = arith.constant dense<0.000000e+00> : vector<4x256xf32>
    %54 = tpu.matmul %53, %43, %cst_39 {dimension_numbers = #tpu.dot_dimension_numbers<[1], [0], [0], [1], [0, 0, 1, 1], [], []>} : vector<4x4xf32>, vector<4x256xf32>, vector<4x256xf32> -> vector<4x256xf32>
    %55 = arith.addf %51, %54 : vector<4x256xf32>
    %c16_i32_40 = arith.constant 16 : i32
    %56 = tpu.dynamic_rotate %22 by %c16_i32_40 dim 1 : vector<4x256xf32>, i32 -> vector<4x256xf32>
    %c240_i32_41 = arith.constant 240 : i32
    %57 = tpu.dynamic_rotate %22 by %c240_i32_41 dim 1 : vector<4x256xf32>, i32 -> vector<4x256xf32>
    %58 = arith.select %14, %57, %56 : vector<4x256xi1>, vector<4x256xf32>
    %59 = arith.select %18, %56, %57 : vector<4x256xi1>, vector<4x256xf32>
    %c2_42 = arith.constant 2 : index
    %c0_43 = arith.constant 0 : index
    %c0_44 = arith.constant 0 : index
    %60 = vector.load %arg2[%c2_42, %c0_43, %c0_44] : memref<9x4x4xf32, #tpu.memory_space<vmem>>, vector<1x4x4xf32>
    %61 = vector.shape_cast %60 : vector<1x4x4xf32> to vector<4x4xf32>
    %cst_45 = arith.constant dense<0.000000e+00> : vector<4x256xf32>
    %62 = tpu.matmul %61, %58, %cst_45 {dimension_numbers = #tpu.dot_dimension_numbers<[1], [0], [0], [1], [0, 0, 1, 1], [], []>} : vector<4x4xf32>, vector<4x256xf32>, vector<4x256xf32> -> vector<4x256xf32>
    %63 = arith.addf %55, %62 : vector<4x256xf32>
    %c5 = arith.constant 5 : index
    %c0_46 = arith.constant 0 : index
    %c0_47 = arith.constant 0 : index
    %64 = vector.load %arg2[%c5, %c0_46, %c0_47] : memref<9x4x4xf32, #tpu.memory_space<vmem>>, vector<1x4x4xf32>
    %65 = vector.shape_cast %64 : vector<1x4x4xf32> to vector<4x4xf32>
    %cst_48 = arith.constant dense<0.000000e+00> : vector<4x256xf32>
    %66 = tpu.matmul %65, %22, %cst_48 {dimension_numbers = #tpu.dot_dimension_numbers<[1], [0], [0], [1], [0, 0, 1, 1], [], []>} : vector<4x4xf32>, vector<4x256xf32>, vector<4x256xf32> -> vector<4x256xf32>
    %67 = arith.addf %63, %66 : vector<4x256xf32>
    %c8 = arith.constant 8 : index
    %c0_49 = arith.constant 0 : index
    %c0_50 = arith.constant 0 : index
    %68 = vector.load %arg2[%c8, %c0_49, %c0_50] : memref<9x4x4xf32, #tpu.memory_space<vmem>>, vector<1x4x4xf32>
    %69 = vector.shape_cast %68 : vector<1x4x4xf32> to vector<4x4xf32>
    %cst_51 = arith.constant dense<0.000000e+00> : vector<4x256xf32>
    %70 = tpu.matmul %69, %59, %cst_51 {dimension_numbers = #tpu.dot_dimension_numbers<[1], [0], [0], [1], [0, 0, 1, 1], [], []>} : vector<4x4xf32>, vector<4x256xf32>, vector<4x256xf32> -> vector<4x256xf32>
    %71 = arith.addf %67, %70 : vector<4x256xf32>
    %72 = vector.broadcast %2 : vector<4x1xf32> to vector<4x256xf32>
    %73 = arith.addf %71, %72 : vector<4x256xf32>
    %c0_52 = arith.constant 0 : index
    %c0_53 = arith.constant 0 : index
    %c0_54 = arith.constant 0 : index
    %c0_55 = arith.constant 0 : index
    %74 = vector.load %arg4[%c0_52, %c0_53, %c0_54, %c0_55] : memref<1x4x4x1xf32, #tpu.memory_space<vmem>>, vector<1x1x4x1xf32>
    %75 = vector.shape_cast %74 : vector<1x1x4x1xf32> to vector<4x1xf32>
    %c0_56 = arith.constant 0 : index
    %c1_57 = arith.constant 1 : index
    %c0_58 = arith.constant 0 : index
    %c0_59 = arith.constant 0 : index
    %76 = vector.load %arg4[%c0_56, %c1_57, %c0_58, %c0_59] : memref<1x4x4x1xf32, #tpu.memory_space<vmem>>, vector<1x1x4x1xf32>
    %77 = vector.shape_cast %76 : vector<1x1x4x1xf32> to vector<4x1xf32>
    %cst_60 = arith.constant dense<0.000000e+00> : vector<4xf32>
    %78 = vector.multi_reduction <add>, %73, %cst_60 [1] : vector<4x256xf32> to vector<4xf32>
    %79 = vector.shape_cast %78 : vector<4xf32> to vector<4x1xf32>
    %80 = arith.mulf %73, %73 : vector<4x256xf32>
    %cst_61 = arith.constant dense<0.000000e+00> : vector<4xf32>
    %81 = vector.multi_reduction <add>, %80, %cst_61 [1] : vector<4x256xf32> to vector<4xf32>
    %82 = vector.shape_cast %81 : vector<4xf32> to vector<4x1xf32>
    %cst_62 = arith.constant 3.906250e-03 : f32
    %83 = vector.broadcast %cst_62 : f32 to vector<4x1xf32>
    %84 = arith.mulf %79, %83 : vector<4x1xf32>
    %85 = arith.mulf %79, %84 : vector<4x1xf32>
    %86 = arith.subf %82, %85 : vector<4x1xf32>
    %cst_63 = arith.constant 0.00392156886 : f32
    %87 = vector.broadcast %cst_63 : f32 to vector<4x1xf32>
    %88 = arith.mulf %86, %87 : vector<4x1xf32>
    %cst_64 = arith.constant 9.99999974E-6 : f32
    %89 = vector.broadcast %cst_64 : f32 to vector<4x1xf32>
    %90 = arith.addf %88, %89 : vector<4x1xf32>
    %91 = vector.broadcast %84 : vector<4x1xf32> to vector<4x256xf32>
    %92 = arith.subf %73, %91 : vector<4x256xf32>
    %93 = math.rsqrt %90 : vector<4x1xf32>
    %94 = vector.broadcast %93 : vector<4x1xf32> to vector<4x256xf32>
    %95 = arith.mulf %92, %94 : vector<4x256xf32>
    %96 = vector.broadcast %77 : vector<4x1xf32> to vector<4x256xf32>
    %97 = arith.mulf %95, %96 : vector<4x256xf32>
    %98 = vector.broadcast %75 : vector<4x1xf32> to vector<4x256xf32>
    %99 = arith.addf %97, %98 : vector<4x256xf32>
    %cst_65 = arith.constant 0.000000e+00 : f32
    %100 = vector.broadcast %cst_65 : f32 to vector<4x256xf32>
    %101 = arith.maximumf %99, %100 : vector<4x256xf32>
    %c1_i32_66 = arith.constant 1 : i32
    %102 = tpu.dynamic_rotate %101 by %c1_i32_66 dim 1 : vector<4x256xf32>, i32 -> vector<4x256xf32>
    %c255_i32_67 = arith.constant 255 : i32
    %103 = tpu.dynamic_rotate %101 by %c255_i32_67 dim 1 : vector<4x256xf32>, i32 -> vector<4x256xf32>
    %104 = arith.select %6, %103, %102 : vector<4x256xi1>, vector<4x256xf32>
    %105 = arith.select %10, %102, %103 : vector<4x256xi1>, vector<4x256xf32>
    %cst_68 = arith.constant 0.000000e+00 : f32
    %106 = vector.broadcast %cst_68 : f32 to vector<4x256xf32>
    %c16_i32_69 = arith.constant 16 : i32
    %107 = tpu.dynamic_rotate %104 by %c16_i32_69 dim 1 : vector<4x256xf32>, i32 -> vector<4x256xf32>
    %c240_i32_70 = arith.constant 240 : i32
    %108 = tpu.dynamic_rotate %104 by %c240_i32_70 dim 1 : vector<4x256xf32>, i32 -> vector<4x256xf32>
    %109 = arith.select %14, %108, %107 : vector<4x256xi1>, vector<4x256xf32>
    %110 = arith.select %18, %107, %108 : vector<4x256xi1>, vector<4x256xf32>
    %c0_71 = arith.constant 0 : index
    %c0_72 = arith.constant 0 : index
    %c0_73 = arith.constant 0 : index
    %111 = vector.load %arg2[%c0_71, %c0_72, %c0_73] : memref<9x4x4xf32, #tpu.memory_space<vmem>>, vector<1x4x4xf32>
    %112 = vector.shape_cast %111 : vector<1x4x4xf32> to vector<4x4xf32>
    %cst_74 = arith.constant dense<0.000000e+00> : vector<4x256xf32>
    %113 = tpu.matmul %112, %109, %cst_74 {dimension_numbers = #tpu.dot_dimension_numbers<[1], [0], [0], [1], [0, 0, 1, 1], [], []>} : vector<4x4xf32>, vector<4x256xf32>, vector<4x256xf32> -> vector<4x256xf32>
    %114 = arith.addf %106, %113 : vector<4x256xf32>
    %c3_75 = arith.constant 3 : index
    %c0_76 = arith.constant 0 : index
    %c0_77 = arith.constant 0 : index
    %115 = vector.load %arg2[%c3_75, %c0_76, %c0_77] : memref<9x4x4xf32, #tpu.memory_space<vmem>>, vector<1x4x4xf32>
    %116 = vector.shape_cast %115 : vector<1x4x4xf32> to vector<4x4xf32>
    %cst_78 = arith.constant dense<0.000000e+00> : vector<4x256xf32>
    %117 = tpu.matmul %116, %104, %cst_78 {dimension_numbers = #tpu.dot_dimension_numbers<[1], [0], [0], [1], [0, 0, 1, 1], [], []>} : vector<4x4xf32>, vector<4x256xf32>, vector<4x256xf32> -> vector<4x256xf32>
    %118 = arith.addf %114, %117 : vector<4x256xf32>
    %c6_79 = arith.constant 6 : index
    %c0_80 = arith.constant 0 : index
    %c0_81 = arith.constant 0 : index
    %119 = vector.load %arg2[%c6_79, %c0_80, %c0_81] : memref<9x4x4xf32, #tpu.memory_space<vmem>>, vector<1x4x4xf32>
    %120 = vector.shape_cast %119 : vector<1x4x4xf32> to vector<4x4xf32>
    %cst_82 = arith.constant dense<0.000000e+00> : vector<4x256xf32>
    %121 = tpu.matmul %120, %110, %cst_82 {dimension_numbers = #tpu.dot_dimension_numbers<[1], [0], [0], [1], [0, 0, 1, 1], [], []>} : vector<4x4xf32>, vector<4x256xf32>, vector<4x256xf32> -> vector<4x256xf32>
    %122 = arith.addf %118, %121 : vector<4x256xf32>
    %c16_i32_83 = arith.constant 16 : i32
    %123 = tpu.dynamic_rotate %101 by %c16_i32_83 dim 1 : vector<4x256xf32>, i32 -> vector<4x256xf32>
    %c240_i32_84 = arith.constant 240 : i32
    %124 = tpu.dynamic_rotate %101 by %c240_i32_84 dim 1 : vector<4x256xf32>, i32 -> vector<4x256xf32>
    %125 = arith.select %14, %124, %123 : vector<4x256xi1>, vector<4x256xf32>
    %126 = arith.select %18, %123, %124 : vector<4x256xi1>, vector<4x256xf32>
    %c1_85 = arith.constant 1 : index
    %c0_86 = arith.constant 0 : index
    %c0_87 = arith.constant 0 : index
    %127 = vector.load %arg2[%c1_85, %c0_86, %c0_87] : memref<9x4x4xf32, #tpu.memory_space<vmem>>, vector<1x4x4xf32>
    %128 = vector.shape_cast %127 : vector<1x4x4xf32> to vector<4x4xf32>
    %cst_88 = arith.constant dense<0.000000e+00> : vector<4x256xf32>
    %129 = tpu.matmul %128, %125, %cst_88 {dimension_numbers = #tpu.dot_dimension_numbers<[1], [0], [0], [1], [0, 0, 1, 1], [], []>} : vector<4x4xf32>, vector<4x256xf32>, vector<4x256xf32> -> vector<4x256xf32>
    %130 = arith.addf %122, %129 : vector<4x256xf32>
    %c4_89 = arith.constant 4 : index
    %c0_90 = arith.constant 0 : index
    %c0_91 = arith.constant 0 : index
    %131 = vector.load %arg2[%c4_89, %c0_90, %c0_91] : memref<9x4x4xf32, #tpu.memory_space<vmem>>, vector<1x4x4xf32>
    %132 = vector.shape_cast %131 : vector<1x4x4xf32> to vector<4x4xf32>
    %cst_92 = arith.constant dense<0.000000e+00> : vector<4x256xf32>
    %133 = tpu.matmul %132, %101, %cst_92 {dimension_numbers = #tpu.dot_dimension_numbers<[1], [0], [0], [1], [0, 0, 1, 1], [], []>} : vector<4x4xf32>, vector<4x256xf32>, vector<4x256xf32> -> vector<4x256xf32>
    %134 = arith.addf %130, %133 : vector<4x256xf32>
    %c7_93 = arith.constant 7 : index
    %c0_94 = arith.constant 0 : index
    %c0_95 = arith.constant 0 : index
    %135 = vector.load %arg2[%c7_93, %c0_94, %c0_95] : memref<9x4x4xf32, #tpu.memory_space<vmem>>, vector<1x4x4xf32>
    %136 = vector.shape_cast %135 : vector<1x4x4xf32> to vector<4x4xf32>
    %cst_96 = arith.constant dense<0.000000e+00> : vector<4x256xf32>
    %137 = tpu.matmul %136, %126, %cst_96 {dimension_numbers = #tpu.dot_dimension_numbers<[1], [0], [0], [1], [0, 0, 1, 1], [], []>} : vector<4x4xf32>, vector<4x256xf32>, vector<4x256xf32> -> vector<4x256xf32>
    %138 = arith.addf %134, %137 : vector<4x256xf32>
    %c16_i32_97 = arith.constant 16 : i32
    %139 = tpu.dynamic_rotate %105 by %c16_i32_97 dim 1 : vector<4x256xf32>, i32 -> vector<4x256xf32>
    %c240_i32_98 = arith.constant 240 : i32
    %140 = tpu.dynamic_rotate %105 by %c240_i32_98 dim 1 : vector<4x256xf32>, i32 -> vector<4x256xf32>
    %141 = arith.select %14, %140, %139 : vector<4x256xi1>, vector<4x256xf32>
    %142 = arith.select %18, %139, %140 : vector<4x256xi1>, vector<4x256xf32>
    %c2_99 = arith.constant 2 : index
    %c0_100 = arith.constant 0 : index
    %c0_101 = arith.constant 0 : index
    %143 = vector.load %arg2[%c2_99, %c0_100, %c0_101] : memref<9x4x4xf32, #tpu.memory_space<vmem>>, vector<1x4x4xf32>
    %144 = vector.shape_cast %143 : vector<1x4x4xf32> to vector<4x4xf32>
    %cst_102 = arith.constant dense<0.000000e+00> : vector<4x256xf32>
    %145 = tpu.matmul %144, %141, %cst_102 {dimension_numbers = #tpu.dot_dimension_numbers<[1], [0], [0], [1], [0, 0, 1, 1], [], []>} : vector<4x4xf32>, vector<4x256xf32>, vector<4x256xf32> -> vector<4x256xf32>
    %146 = arith.addf %138, %145 : vector<4x256xf32>
    %c5_103 = arith.constant 5 : index
    %c0_104 = arith.constant 0 : index
    %c0_105 = arith.constant 0 : index
    %147 = vector.load %arg2[%c5_103, %c0_104, %c0_105] : memref<9x4x4xf32, #tpu.memory_space<vmem>>, vector<1x4x4xf32>
    %148 = vector.shape_cast %147 : vector<1x4x4xf32> to vector<4x4xf32>
    %cst_106 = arith.constant dense<0.000000e+00> : vector<4x256xf32>
    %149 = tpu.matmul %148, %105, %cst_106 {dimension_numbers = #tpu.dot_dimension_numbers<[1], [0], [0], [1], [0, 0, 1, 1], [], []>} : vector<4x4xf32>, vector<4x256xf32>, vector<4x256xf32> -> vector<4x256xf32>
    %150 = arith.addf %146, %149 : vector<4x256xf32>
    %c8_107 = arith.constant 8 : index
    %c0_108 = arith.constant 0 : index
    %c0_109 = arith.constant 0 : index
    %151 = vector.load %arg2[%c8_107, %c0_108, %c0_109] : memref<9x4x4xf32, #tpu.memory_space<vmem>>, vector<1x4x4xf32>
    %152 = vector.shape_cast %151 : vector<1x4x4xf32> to vector<4x4xf32>
    %cst_110 = arith.constant dense<0.000000e+00> : vector<4x256xf32>
    %153 = tpu.matmul %152, %142, %cst_110 {dimension_numbers = #tpu.dot_dimension_numbers<[1], [0], [0], [1], [0, 0, 1, 1], [], []>} : vector<4x4xf32>, vector<4x256xf32>, vector<4x256xf32> -> vector<4x256xf32>
    %154 = arith.addf %150, %153 : vector<4x256xf32>
    %155 = vector.broadcast %2 : vector<4x1xf32> to vector<4x256xf32>
    %156 = arith.addf %154, %155 : vector<4x256xf32>
    %c0_111 = arith.constant 0 : index
    %c2_112 = arith.constant 2 : index
    %c0_113 = arith.constant 0 : index
    %c0_114 = arith.constant 0 : index
    %157 = vector.load %arg4[%c0_111, %c2_112, %c0_113, %c0_114] : memref<1x4x4x1xf32, #tpu.memory_space<vmem>>, vector<1x1x4x1xf32>
    %158 = vector.shape_cast %157 : vector<1x1x4x1xf32> to vector<4x1xf32>
    %c0_115 = arith.constant 0 : index
    %c3_116 = arith.constant 3 : index
    %c0_117 = arith.constant 0 : index
    %c0_118 = arith.constant 0 : index
    %159 = vector.load %arg4[%c0_115, %c3_116, %c0_117, %c0_118] : memref<1x4x4x1xf32, #tpu.memory_space<vmem>>, vector<1x1x4x1xf32>
    %160 = vector.shape_cast %159 : vector<1x1x4x1xf32> to vector<4x1xf32>
    %cst_119 = arith.constant dense<0.000000e+00> : vector<4xf32>
    %161 = vector.multi_reduction <add>, %156, %cst_119 [1] : vector<4x256xf32> to vector<4xf32>
    %162 = vector.shape_cast %161 : vector<4xf32> to vector<4x1xf32>
    %163 = arith.mulf %156, %156 : vector<4x256xf32>
    %cst_120 = arith.constant dense<0.000000e+00> : vector<4xf32>
    %164 = vector.multi_reduction <add>, %163, %cst_120 [1] : vector<4x256xf32> to vector<4xf32>
    %165 = vector.shape_cast %164 : vector<4xf32> to vector<4x1xf32>
    %cst_121 = arith.constant 3.906250e-03 : f32
    %166 = vector.broadcast %cst_121 : f32 to vector<4x1xf32>
    %167 = arith.mulf %162, %166 : vector<4x1xf32>
    %168 = arith.mulf %162, %167 : vector<4x1xf32>
    %169 = arith.subf %165, %168 : vector<4x1xf32>
    %cst_122 = arith.constant 0.00392156886 : f32
    %170 = vector.broadcast %cst_122 : f32 to vector<4x1xf32>
    %171 = arith.mulf %169, %170 : vector<4x1xf32>
    %cst_123 = arith.constant 9.99999974E-6 : f32
    %172 = vector.broadcast %cst_123 : f32 to vector<4x1xf32>
    %173 = arith.addf %171, %172 : vector<4x1xf32>
    %174 = vector.broadcast %167 : vector<4x1xf32> to vector<4x256xf32>
    %175 = arith.subf %156, %174 : vector<4x256xf32>
    %176 = math.rsqrt %173 : vector<4x1xf32>
    %177 = vector.broadcast %176 : vector<4x1xf32> to vector<4x256xf32>
    %178 = arith.mulf %175, %177 : vector<4x256xf32>
    %179 = vector.broadcast %160 : vector<4x1xf32> to vector<4x256xf32>
    %180 = arith.mulf %178, %179 : vector<4x256xf32>
    %181 = vector.broadcast %158 : vector<4x1xf32> to vector<4x256xf32>
    %182 = arith.addf %180, %181 : vector<4x256xf32>
    %183 = arith.addf %182, %1 : vector<4x256xf32>
    %c0_124 = arith.constant 0 : index
    %c0_125 = arith.constant 0 : index
    %c0_126 = arith.constant 0 : index
    %184 = vector.load %arg6[%c0_124, %c0_125, %c0_126] : memref<1x4x256xf32, #tpu.memory_space<vmem>>, vector<1x4x256xf32>
    %185 = vector.shape_cast %184 : vector<1x4x256xf32> to vector<4x256xf32>
    %186 = vector.shape_cast %183 : vector<4x256xf32> to vector<1x4x256xf32>
    tpu.vector_store %arg6[%c0_124, %c0_125, %c0_126], %186 {strides = array<i32>} : memref<1x4x256xf32, #tpu.memory_space<vmem>>, vector<1x4x256xf32>,
    return
  }
  func.func @transform_0(%arg0: i32) -> (i32, i32, i32) {
    %c0_i32 = arith.constant 0 : i32
    %c0_i32_0 = arith.constant 0 : i32
    %c0_i32_1 = arith.constant 0 : i32
    return %arg0, %c0_i32, %c0_i32_0 : i32, i32, i32
  }
  func.func @transform_1(%arg0: i32) -> (i32, i32, i32) {
    %c0_i32 = arith.constant 0 : i32
    %c0_i32_0 = arith.constant 0 : i32
    %c0_i32_1 = arith.constant 0 : i32
    %c0_i32_2 = arith.constant 0 : i32
    return %c0_i32, %c0_i32_0, %c0_i32_1 : i32, i32, i32
  }
  func.func @transform_2(%arg0: i32) -> (i32, i32) {
    %c0_i32 = arith.constant 0 : i32
    %c0_i32_0 = arith.constant 0 : i32
    %c0_i32_1 = arith.constant 0 : i32
    return %c0_i32, %c0_i32_0 : i32, i32
  }
  func.func @transform_3(%arg0: i32) -> (i32, i32, i32, i32) {
    %c0_i32 = arith.constant 0 : i32
    %c0_i32_0 = arith.constant 0 : i32
    %c0_i32_1 = arith.constant 0 : i32
    %c0_i32_2 = arith.constant 0 : i32
    return %arg0, %c0_i32, %c0_i32_0, %c0_i32_1 : i32, i32, i32, i32
  }
  func.func @transform_4(%arg0: i32) -> (i32, i32, i32) {
    %c0_i32 = arith.constant 0 : i32
    %c0_i32_0 = arith.constant 0 : i32
    %c0_i32_1 = arith.constant 0 : i32
    %c0_i32_2 = arith.constant 0 : i32
    return %c0_i32, %c0_i32_0, %c0_i32_1 : i32, i32, i32
  }
  func.func @transform_5(%arg0: i32) -> (i32, i32, i32) {
    %c0_i32 = arith.constant 0 : i32
    %c0_i32_0 = arith.constant 0 : i32
    %c0_i32_1 = arith.constant 0 : i32
    return %arg0, %c0_i32, %c0_i32_0 : i32, i32, i32
  }
}

</mosaic_0001>

<bundles_post_ra>
// kernel: res_adain_block.1
= control target key start
LH: loop header
LB: loop body
LE: loop exit
PB: predicated region body
PF: predicated region fallthrough
CT: control target
= control target key end

     0   :  { %s2250_s18 = smov 0   ;;  %s2650_s0 = inlined_call_operand.vmem [shape: f32[2,4,256], index: 0, kind: input, shape index: {}]   ;;  %s2651_s1 = inlined_call_operand.vmem [shape: f32[9,4,4], index: 1, kind: input, shape index: {}]   ;;  %s2652_s2 = inlined_call_operand.vmem [shape: f32[4,1], index: 2, kind: input, shape index: {}]   ;;  %s2653_s3 = inlined_call_operand.vmem [shape: f32[2,4,4,1], index: 3, kind: input, shape index: {}]   ;;  %s2654_s4 = inlined_call_operand.vmem [shape: f32[4,4,256], index: 4, kind: input, shape index: {}]   ;;  %s2655_s5 = inlined_call_operand.vmem [shape: f32[2,4,256], index: 5, kind: output, shape index: {}]  }
   0x1 LB: > { %s2069_s19 = sadd.s32 4294967295, %s2212_s18   ;;  %p2073_p0 = scmp.ge.s32.totalorder %s2212_s18, 1  ;;  %s2212_s18 = sphi %s2250_s18, %s15_s18  }
   0x2   : > { %p197_p1 = scmp.lt.s32.totalorder %s2212_s18, 3 }
   0x4   : > { %p198_p2 = pnand %p2073_p0, %p197_p1 }
   0x5   : > { %p230_p3 = scmp.lt.s32.totalorder (!%p198_p2), %s2069_s19, 1  ;;  %s2214_s24 = smov (!%p198_p2), 127   ;;  %v265_v2 = vlaneseq (!%p198_p2)  ;;  %v2216_v6 = vmov (!%p198_p2), 0.0   ;;  %v2287_v7 = vld [vmem:[%s2654_s4] sm:$0xff] (!%p198_p2)  ;;  %vm321_vm3 = vcmask (!%p198_p2), 1043456   ;;  %vm317_vm4 = vcmask (!%p198_p2), 31744  }
   0x6   : > { %201 = sbr.rel (%p198_p2) target bundleno = 1418 (0x58a), region = 40  ;;  %s2215_s25 = smov (!%p198_p2), 1   ;;  %390 = vmatprep.mubr.f32.mxu0 (!%p198_p2), %v2216_v6  ;;  %1271 = vmatprep.mubr.f32.mxu1 (!%p198_p2), %v2216_v6  ;;  %vm248_vm2 = vcmp.gt.f32.partialorder (!%p198_p2), %v2287_v7, 0.5  ;;  %v2306_v18 = vld [vmem:[%s2651_s1 + $0xc] sm:$0xf] (!%p198_p2)  ;;  %v2219_v23 = vmov (!%p198_p2), 0  }
   0x7   : > { %v2280_v3 = vand.u32 (!%p198_p2), 127, %v265_v2  ;;  %s2217_s28 = smov (!%p198_p2), 16   ;;  %s2218_s6 = smov (!%p198_p2), 112   ;;  %v2319_v19 = vld [vmem:[%s2654_s4 + $0x8] sm:$0xff] (!%p198_p2)  ;;  %v246_v22 = vld [vmem:[%s2652_s2] sm:$0xf] (!%p198_p2)  ;;  %2199 = vset.pattern.permute.xlu0 (!%p198_p2), %v2219_v23  ;;  %2200 = vset.pattern.permute.xlu1 (!%p198_p2), %v2219_v23 }
   0x8   : > { %vm251_vm5 = vcmp.gt.f32.partialorder (!%p198_p2), %v2319_v19, 0.5  ;;  %v2354_v27 = vld [vmem:[%s2654_s4 + $0x10] sm:$0xff] (!%p198_p2)  ;;  %v2359_v28 = vld [vmem:[%s2654_s4 + $0x18] sm:$0xff] (!%p198_p2)  ;;  %v2382_v43 = vld [vmem:[%s2651_s1] sm:$0xf] (!%p198_p2) }
   0x9   : > { %vm274_vm0 = vcmp.lt.s32.totalorder (!%p198_p2), %v2280_v3, 127  ;;  %vm267_vm1 = vcmp.lt.s32.totalorder (!%p198_p2), %v2280_v3, 1  ;;  %vm294_vm6 = vcmp.lt.s32.totalorder (!%p198_p2), %v2280_v3, 16  ;;  %vm301_vm7 = vcmp.lt.s32.totalorder (!%p198_p2), %v2280_v3, 112  ;;  %v2400_v54 = vld [vmem:[%s2651_s1 + $0x18] sm:$0xf] (!%p198_p2) }
   0xa   : > { %vm254_vm8 = vcmp.gt.f32.partialorder (!%p198_p2), %v2354_v27, 0.5  ;;  %vm257_vm9 = vcmp.gt.f32.partialorder (!%p198_p2), %v2359_v28, 0.5  ;;  %v2414_v59 = vld [vmem:[%s2651_s1 + $0x4] sm:$0xf] (!%p198_p2) }
   0xd   : > { %s2657_s19 = smov (!%p230_p3, %s2069_s19), 1 }
   0xe   : > { %s2150_s20 = sshll.u32 %s2657_s19, 3  ;;  %s2151_s13 = sshll.u32 %s2657_s19, 4 }
   0xf   : > { %s234_s23 = scalar_lea.vmem %s2650_s0, %s2150_s20  ;;  %s2494_s16 = scalar_lea.vmem %s2653_s3, %s2151_s13 }
  0x10   : > { %v2266_v0 = vld [vmem:[%s234_s23] sm:$0xff] }
  0x11   : > { %270 = vrot.lane.b32.xlu1 %v2266_v0, %s2214_s24  ;;  %261 = vrot.lane.b32.xlu0 %v2266_v0, %s2215_s25  ;;  %v2274_v1 = vcombine.high %v2266_v0, %v2266_v0 }
  0x15   : > { %272 = vrot.lane.b32.xlu1 %v2274_v1, %s2214_s24  ;;  %263 = vrot.lane.b32.xlu0 %v2274_v1, %s2215_s25 }
  0x83   : > { %v271_v4 = vpop.permute.xlu1 %270  ;;  %v262_v5 = vpop.permute.xlu0 %261 }
  0x87   : > { %v273_v8 = vpop.permute.xlu1 %272  ;;  %v264_v9 = vpop.permute.xlu0 %263 }
  0x88   : > { %v275_v10 = vsel %vm274_vm0, %v271_v4, %v273_v8  ;;  %v276_v11 = vsel %vm274_vm0, %v273_v8, %v271_v4  ;;  %v268_v12 = vsel %vm267_vm1, %v262_v5, %v264_v9  ;;  %v269_v13 = vsel %vm267_vm1, %v264_v9, %v262_v5  ;;  %v2435_v9 = vld [vmem:[%s2651_s1 + $0x10] sm:$0xf] }
  0x89   : > { %v279_v14 = vcombine.low %v275_v10, %v276_v11  ;;  %v283_v15 = vcombine.low %v269_v13, %v268_v12  ;;  %v2445_v11 = vld [vmem:[%s2651_s1 + $0x1c] sm:$0xf]  ;;  %v2458_v13 = vld [vmem:[%s2651_s1 + $0x8] sm:$0xf] }
  0x8b   : > { %v285_v16 = vsel %vm248_vm2, %v279_v14, %v283_v15  ;;  %v2330_v20 = vsel %vm251_vm5, %v283_v15, %v279_v14  ;;  %v2469_v15 = vld [vmem:[%s2651_s1 + $0x14] sm:$0xf] }
  0x8c   : > { %290 = vrot.lane.b32.xlu0 %v285_v16, %s2217_s28  ;;  %v288_v17 = vcombine.high %v285_v16, %v285_v16  ;;  %v2338_v21 = vcombine.high %v2330_v20, %v2330_v20 }
  0x8e   : > { %292 = vrot.lane.b32.xlu1 %v288_v17, %s2217_s28  ;;  %2084 = vmatprep.subr.msk.mxu0 %vm321_vm3, %v288_v17 }
  0x8f   : > { %2085 = vmatpush1.msk.msra.mxu0 %vm321_vm3, %v285_v16 }
  0x90   : > { %297 = vrot.lane.b32.xlu0 %v285_v16, %s2218_s6  ;;  %2086 = vmatmul.mubr.msk.f32.vlgmr.msra.gmra.mrb[0].mxu0 %vm317_vm4, %v2306_v18  ;;  %v2478_v16 = vld [vmem:[%s2651_s1 + $0x20] sm:$0xf] }
  0x91   : > { %470 = vmatprep.mubr.f32.mxu0 %v2216_v6 }
  0x92   : > { %299 = vrot.lane.b32.xlu1 %v288_v17, %s2218_s6 }
  0x94   : > { %561 = vrot.lane.b32.xlu0 %v2266_v0, %s2217_s28 }
  0x96   : > { %563 = vrot.lane.b32.xlu1 %v2274_v1, %s2217_s28 }
  0x98   : > { %567 = vrot.lane.b32.xlu0 %v2266_v0, %s2218_s6 }
  0x9a   : > { %569 = vrot.lane.b32.xlu1 %v2274_v1, %s2218_s6 }
  0x9c   : > { %836 = vrot.lane.b32.xlu0 %v2330_v20, %s2217_s28 }
  0x9e   : > { %838 = vrot.lane.b32.xlu1 %v2338_v21, %s2217_s28 }
  0xa0   : > { %842 = vrot.lane.b32.xlu0 %v2330_v20, %s2218_s6 }
  0xa2   : > { %844 = vrot.lane.b32.xlu1 %v2338_v21, %s2218_s6 }
  0xa4   : > { %1110 = vperm.xlu0 %2199, %v246_v22  }
  0xfe   : > { %v291_v24 = vpop.permute.xlu0 %290 }
 0x100   : > { %v293_v25 = vpop.permute.xlu1 %292 }
 0x101   : > { %v295_v29 = vsel %vm294_vm6, %v291_v24, %v293_v25  ;;  %v296_v30 = vsel %vm294_vm6, %v293_v25, %v291_v24 }
 0x102   : > { %v298_v26 = vpop.permute.xlu0 %297  ;;  %v310_v34 = vcombine.low %v296_v30, %v295_v29 }
 0x104   : > { %v300_v31 = vpop.permute.xlu1 %299 }
 0x105   : > { %v302_v32 = vsel %vm301_vm7, %v298_v26, %v300_v31  ;;  %v303_v33 = vsel %vm301_vm7, %v300_v31, %v298_v26 }
 0x106   : > { %v306_v35 = vcombine.low %v302_v32, %v303_v33  ;;  %v562_v36 = vpop.permute.xlu0 %561 }
 0x108   : > { %v312_v37 = vsel %vm254_vm8, %v306_v35, %v310_v34  ;;  %v313_v38 = vsel %vm257_vm9, %v310_v34, %v306_v35  ;;  %v564_v39 = vpop.permute.xlu1 %563  ;;  %v2118_v34 = vld [vmem:[%s2494_s16 + $0x4] sm:$0xf]  ;;  %v1115_v35 = vld [vmem:[%s2494_s16] sm:$0xf] }
 0x109   : > { %v565_v40 = vsel %vm294_vm6, %v562_v36, %v564_v39  ;;  %v566_v41 = vsel %vm294_vm6, %v564_v39, %v562_v36  ;;  %v398_v42 = vcombine.high %v312_v37, %v312_v37  ;;  %v480_v44 = vcombine.high %v313_v38, %v313_v38 }
 0x10a   : > { %v579_v45 = vcombine.low %v566_v41, %v565_v40  ;;  %v568_v46 = vpop.permute.xlu0 %567 }
 0x10b   : > { %2087 = vmatprep.subr.msk.mxu0 %vm321_vm3, %v398_v42 }
 0x10c   : > { %v570_v47 = vpop.permute.xlu1 %569  ;;  %2088 = vmatpush1.msk.msra.mxu0 %vm321_vm3, %v312_v37 }
 0x10d   : > { %v571_v48 = vsel %vm301_vm7, %v568_v46, %v570_v47  ;;  %v572_v49 = vsel %vm301_vm7, %v570_v47, %v568_v46  ;;  %2089 = vmatmul.mubr.msk.f32.vlgmr.msra.gmra.mrb[0].mxu0 %vm317_vm4, %v2382_v43  ;;  %2091 = vmatprep.subr.msk.mxu0 %vm321_vm3, %v480_v44 }
 0x10e   : > { %v575_v50 = vcombine.low %v571_v48, %v572_v49  ;;  %2092 = vmatpush1.msk.msra.mxu0 %vm321_vm3, %v313_v38  ;;  %552 = vmatprep.mubr.f32.mxu0 %v2216_v6  ;;  %v837_v55 = vpop.permute.xlu0 %836 }
 0x110   : > { %v581_v51 = vsel %vm254_vm8, %v575_v50, %v579_v45  ;;  %v839_v53 = vpop.permute.xlu1 %838  ;;  %v582_v57 = vsel %vm257_vm9, %v579_v45, %v575_v50 }
 0x111   : > { %v586_v52 = vcombine.high %v581_v51, %v581_v51  ;;  %v840_v62 = vsel %vm294_vm6, %v837_v55, %v839_v53  ;;  %v841_v63 = vsel %vm294_vm6, %v839_v53, %v837_v55  ;;  %v752_v2 = vcombine.high %v582_v57, %v582_v57 }
 0x112   : > { %v843_v58 = vpop.permute.xlu0 %842  ;;  %v854_v5 = vcombine.low %v841_v63, %v840_v62 }
 0x113   : > { %2095 = vmatprep.subr.msk.mxu0 %vm321_vm3, %v586_v52 }
 0x114   : > { %v845_v56 = vpop.permute.xlu1 %844 }
 0x115   : > { %2093 = vmatmul.mubr.msk.f32.vlgmr.msra.gmra.mrb[0].mxu0 %vm317_vm4, %v2400_v54  ;;  %v846_v60 = vsel %vm301_vm7, %v843_v58, %v845_v56  ;;  %v847_v61 = vsel %vm301_vm7, %v845_v56, %v843_v58 }
 0x116   : > { %2096 = vmatpush1.msk.msra.mxu0 %vm321_vm3, %v581_v51  ;;  %658 = vmatprep.mubr.f32.mxu0 %v2216_v6  ;;  %v850_v4 = vcombine.low %v846_v60, %v847_v61 }
 0x117   : > { %2099 = vmatprep.subr.msk.mxu0 %vm321_vm3, %v2274_v1 }
 0x118   : > { %v856_v8 = vsel %vm254_vm8, %v850_v4, %v854_v5  ;;  %v857_v12 = vsel %vm257_vm9, %v854_v5, %v850_v4 }
 0x119   : > { %v861_v10 = vcombine.high %v856_v8, %v856_v8  ;;  %v1027_v14 = vcombine.high %v857_v12, %v857_v12 }
 0x11d   : > { %2097 = vmatmul.mubr.msk.f32.vlgmr.msra.gmra.mrb[0].mxu0 %vm317_vm4, %v2414_v59 }
 0x11e   : > { %2100 = vmatpush1.msk.msra.mxu0 %vm321_vm3, %v2266_v0  ;;  %740 = vmatprep.mubr.f32.mxu0 %v2216_v6 }
 0x11f   : > { %2103 = vmatprep.subr.msk.mxu0 %vm321_vm3, %v752_v2 }
 0x123   : > { %v2482_v17 = vpop.permute.xlu0 %1110 }
 0x125   : > { %2101 = vmatmul.mubr.msk.f32.vlgmr.msra.gmra.mrb[0].mxu0 %vm317_vm4, %v2435_v9 }
 0x126   : > { %2104 = vmatpush1.msk.msra.mxu0 %vm321_vm3, %v582_v57  ;;  %824 = vmatprep.mubr.f32.mxu0 %v2216_v6 }
 0x127   : > { %2107 = vmatprep.subr.msk.mxu0 %vm321_vm3, %v861_v10 }
 0x12d   : > { %2105 = vmatmul.mubr.msk.f32.vlgmr.msra.gmra.mrb[0].mxu0 %vm317_vm4, %v2445_v11 }
 0x12e   : > { %2108 = vmatpush1.msk.msra.mxu0 %vm321_vm3, %v856_v8  ;;  %933 = vmatprep.mubr.f32.mxu0 %v2216_v6 }
 0x12f   : > { %2111 = vmatprep.subr.msk.mxu0 %vm321_vm3, %v2338_v21 }
 0x135   : > { %2109 = vmatmul.mubr.msk.f32.vlgmr.msra.gmra.mrb[0].mxu0 %vm317_vm4, %v2458_v13 }
 0x136   : > { %2112 = vmatpush1.msk.msra.mxu0 %vm321_vm3, %v2330_v20  ;;  %1015 = vmatprep.mubr.f32.mxu0 %v2216_v6 }
 0x137   : > { %2115 = vmatprep.subr.msk.mxu0 %vm321_vm3, %v1027_v14 }
 0x13d   : > { %2113 = vmatmul.mubr.msk.f32.vlgmr.msra.gmra.mrb[0].mxu0 %vm317_vm4, %v2469_v15 }
 0x13e   : > { %2116 = vmatpush1.msk.msra.mxu0 %vm321_vm3, %v857_v12  ;;  %1099 = vmatprep.mubr.f32.mxu0 %v2216_v6 }
 0x145   : > { %2117 = vmatmul.mubr.msk.f32.vlgmr.msra.gmra.mrb[0].mxu0 %vm317_vm4, %v2478_v16 }
 0x218   : > { %v1101_v20 = vpop.f32.mrb[0].mxu0 }
 0x219   : > { %v1113_v21 = vadd.f32 %v2482_v17, %v1101_v20  ;;  %v1103_v22 = vpop.f32.mrb[1].mxu0 }
 0x21a   : > { %v1114_v23 = vadd.f32 %v2482_v17, %v1103_v22 }
 0x21b   : > { %v1118_v24 = vsel %vm321_vm3, %v1113_v21, 0.0  ;;  %v1123_v25 = vmul.f32 %v1113_v21, %v1113_v21 }
 0x21c   : > { %v1119_v26 = vsel %vm321_vm3, %v1114_v23, 0.0  ;;  %v1124_v29 = vmul.f32 %v1114_v23, %v1114_v23 }
 0x21d   : > { %v1120_v30 = vadd.f32 %v1119_v26, %v1118_v24  ;;  %v1125_v31 = vsel %vm321_vm3, %v1123_v25, 0.0 }
 0x21e   : > { %v1126_v32 = vsel %vm321_vm3, %v1124_v29, 0.0 }
 0x21f   : > { %1121 = vadd.xlane.f32.xlu1 %v1120_v30  ;;  %v1127_v33 = vadd.f32 %v1126_v32, %v1125_v31 }
 0x221   : > { %1128 = vadd.xlane.f32.xlu0 %v1127_v33 }
 0x230   : > { %1142 = vperm.xlu1 %2200, %v2118_v34  }
 0x237   : > { %1149 = vperm.xlu0 %2199, %v1115_v35  }
 0x2ac   : > { %v1122_v36 = vpop.xlane.xlu1 %1121 }
 0x2ad   : > { %v1130_v37 = vmul.f32 0.00390625, %v1122_v36 }
 0x2ae   : > { %v1129_v39 = vpop.xlane.xlu0 %1128 }
 0x2af   : > { %v1131_v38 = vmul.f32 %v1130_v37, %v1122_v36  ;;  %v1135_v44 = vsub.f32 %v1113_v21, %v1130_v37  ;;  %v1136_v45 = vsub.f32 %v1114_v23, %v1130_v37 }
 0x2b0   : > { %v1143_v47 = vpop.permute.xlu1 %1142 }
 0x2b1   : > { %v1132_v40 = vsub.f32 %v1129_v39, %v1131_v38 }
 0x2b3   : > { %v1133_v41 = vmul.f32 0.003921569, %v1132_v40 }
 0x2b5   : > { %v1134_v42 = vadd.f32 1e-05, %v1133_v41 }
 0x2b6   : > { %v1150_v52 = vpop.permute.xlu0 %1149 }
 0x2b7   : > { %2202 = vrsqrt.f32 %v1134_v42 }
 0x2c1   : > { %v2203_v46 = vpop.eup %2202 }
 0x2c2   : > { %v1138_v48 = vmul.f32 %v2203_v46, %v1135_v44  ;;  %v1139_v49 = vmul.f32 %v2203_v46, %v1136_v45 }
 0x2c4   : > { %v1145_v50 = vmul.f32 %v1143_v47, %v1138_v48  ;;  %v1146_v51 = vmul.f32 %v1143_v47, %v1139_v49 }
 0x2c6   : > { %v1152_v53 = vadd.f32 %v1150_v52, %v1145_v50  ;;  %v1153_v55 = vadd.f32 %v1150_v52, %v1146_v51 }
 0x2c8   : > { %v2498_v56 = vmax.f32 %v1152_v53, 0.0  ;;  %v2504_v57 = vmax.f32 %v1153_v55, 0.0 }
 0x2ca   : > { %1162 = vrot.lane.b32.xlu0 %v2498_v56, %s2214_s24  ;;  %1156 = vrot.lane.b32.xlu1 %v2498_v56, %s2215_s25 }
 0x2ce   : > { %1158 = vrot.lane.b32.xlu1 %v2504_v57, %s2215_s25 }
 0x2d2   : > { %1164 = vrot.lane.b32.xlu1 %v2504_v57, %s2214_s24 }
 0x33c   : > { %v1157_v58 = vpop.permute.xlu1 %1156  ;;  %v1163_v63 = vpop.permute.xlu0 %1162 }
 0x340   : > { %v1159_v60 = vpop.permute.xlu1 %1158 }
 0x341   : > { %v1160_v61 = vsel %vm267_vm1, %v1157_v58, %v1159_v60  ;;  %v1161_v62 = vsel %vm267_vm1, %v1159_v60, %v1157_v58 }
 0x342   : > { %v1174_v8 = vcombine.low %v1161_v62, %v1160_v61 }
 0x344   : > { %v1165_v2 = vpop.permute.xlu1 %1164 }
 0x345   : > { %v1166_v4 = vsel %vm274_vm0, %v1163_v63, %v1165_v2  ;;  %v1167_v5 = vsel %vm274_vm0, %v1165_v2, %v1163_v63 }
 0x346   : > { %v1170_v10 = vcombine.low %v1166_v4, %v1167_v5  ;;  %v2146_v5 = vld [vmem:[%s2494_s16 + $0x8] sm:$0xf] }
 0x348   : > { %v1176_v12 = vsel %vm248_vm2, %v1170_v10, %v1174_v8  ;;  %v2537_v7 = vsel %vm251_vm5, %v1174_v8, %v1170_v10  ;;  %v2147_v8 = vld [vmem:[%s2494_s16 + $0xc] sm:$0xf] }
 0x349   : > { %1181 = vrot.lane.b32.xlu0 %v1176_v12, %s2217_s28  ;;  %v1179_v14 = vcombine.high %v1176_v12, %v1176_v12 }
 0x34b   : > { %1183 = vrot.lane.b32.xlu1 %v1179_v14, %s2217_s28  ;;  %2119 = vmatprep.subr.msk.mxu1 %vm321_vm3, %v1179_v14 }
 0x34c   : > { %2120 = vmatpush1.msk.msra.mxu1 %vm321_vm3, %v1176_v12 }
 0x34d   : > { %1187 = vrot.lane.b32.xlu0 %v1176_v12, %s2218_s6  ;;  %2121 = vmatmul.mubr.msk.f32.vlgmr.msra.gmra.mrb[0].mxu1 %vm317_vm4, %v2306_v18  ;;  %v2545_v18 = vcombine.high %v2537_v7, %v2537_v7 }
 0x34e   : > { %1348 = vmatprep.mubr.f32.mxu1 %v2216_v6 }
 0x34f   : > { %1189 = vrot.lane.b32.xlu1 %v1179_v14, %s2218_s6 }
 0x351   : > { %1434 = vrot.lane.b32.xlu0 %v2498_v56, %s2217_s28 }
 0x353   : > { %1436 = vrot.lane.b32.xlu1 %v2504_v57, %s2217_s28 }
 0x355   : > { %1440 = vrot.lane.b32.xlu0 %v2498_v56, %s2218_s6 }
 0x357   : > { %1442 = vrot.lane.b32.xlu1 %v2504_v57, %s2218_s6 }
 0x359   : > { %1696 = vrot.lane.b32.xlu0 %v2537_v7, %s2217_s28 }
 0x35b   : > { %1698 = vrot.lane.b32.xlu1 %v2545_v18, %s2217_s28  ;;  %s244_s28 = scalar_lea.vmem %s2655_s5, %s2150_s20 }
 0x35d   : > { %1702 = vrot.lane.b32.xlu0 %v2537_v7, %s2218_s6 }
 0x35f   : > { %1704 = vrot.lane.b32.xlu1 %v2545_v18, %s2218_s6 }
 0x3bb   : > { %v1182_v19 = vpop.permute.xlu0 %1181 }
 0x3bd   : > { %v1184_v20 = vpop.permute.xlu1 %1183 }
 0x3be   : > { %v1185_v22 = vsel %vm294_vm6, %v1182_v19, %v1184_v20  ;;  %v1186_v23 = vsel %vm294_vm6, %v1184_v20, %v1182_v19 }
 0x3bf   : > { %v1188_v21 = vpop.permute.xlu0 %1187  ;;  %v1199_v29 = vcombine.low %v1186_v23, %v1185_v22 }
 0x3c1   : > { %v1190_v24 = vpop.permute.xlu1 %1189 }
 0x3c2   : > { %v1191_v25 = vsel %vm301_vm7, %v1188_v21, %v1190_v24  ;;  %v1192_v26 = vsel %vm301_vm7, %v1190_v24, %v1188_v21 }
 0x3c3   : > { %v1195_v30 = vcombine.low %v1191_v25, %v1192_v26  ;;  %v1435_v31 = vpop.permute.xlu0 %1434 }
 0x3c5   : > { %v1201_v32 = vsel %vm254_vm8, %v1195_v30, %v1199_v29  ;;  %v1202_v33 = vsel %vm257_vm9, %v1199_v29, %v1195_v30  ;;  %v1437_v34 = vpop.permute.xlu1 %1436 }
 0x3c6   : > { %v1279_v35 = vcombine.high %v1201_v32, %v1201_v32  ;;  %v1438_v36 = vsel %vm294_vm6, %v1435_v31, %v1437_v34  ;;  %v1439_v37 = vsel %vm294_vm6, %v1437_v34, %v1435_v31  ;;  %v1356_v38 = vcombine.high %v1202_v33, %v1202_v33 }
 0x3c7   : > { %v1441_v39 = vpop.permute.xlu0 %1440  ;;  %v1452_v44 = vcombine.low %v1439_v37, %v1438_v36 }
 0x3c8   : > { %2122 = vmatprep.subr.msk.mxu1 %vm321_vm3, %v1279_v35 }
 0x3c9   : > { %v1443_v40 = vpop.permute.xlu1 %1442  ;;  %2123 = vmatpush1.msk.msra.mxu1 %vm321_vm3, %v1201_v32 }
 0x3ca   : > { %v1444_v41 = vsel %vm301_vm7, %v1441_v39, %v1443_v40  ;;  %v1445_v42 = vsel %vm301_vm7, %v1443_v40, %v1441_v39  ;;  %2124 = vmatmul.mubr.msk.f32.vlgmr.msra.gmra.mrb[0].mxu1 %vm317_vm4, %v2382_v43  ;;  %2125 = vmatprep.subr.msk.mxu1 %vm321_vm3, %v1356_v38 }
 0x3cb   : > { %v1448_v45 = vcombine.low %v1444_v41, %v1445_v42  ;;  %2126 = vmatpush1.msk.msra.mxu1 %vm321_vm3, %v1202_v33  ;;  %1425 = vmatprep.mubr.f32.mxu1 %v2216_v6  ;;  %v1697_v49 = vpop.permute.xlu0 %1696 }
 0x3cd   : > { %v1454_v46 = vsel %vm254_vm8, %v1448_v45, %v1452_v44  ;;  %v1699_v48 = vpop.permute.xlu1 %1698  ;;  %v1455_v50 = vsel %vm257_vm9, %v1452_v44, %v1448_v45 }
 0x3ce   : > { %v1457_v47 = vcombine.high %v1454_v46, %v1454_v46  ;;  %v1701_v55 = vsel %vm294_vm6, %v1699_v48, %v1697_v49 }
 0x3cf   : > { %v1703_v51 = vpop.permute.xlu0 %1702 }
 0x3d0   : > { %2128 = vmatprep.subr.msk.mxu1 %vm321_vm3, %v1457_v47 }
 0x3d1   : > { %v1705_v43 = vpop.permute.xlu1 %1704 }
 0x3d2   : > { %2127 = vmatmul.mubr.msk.f32.vlgmr.msra.gmra.mrb[0].mxu1 %vm317_vm4, %v2400_v54  ;;  %v1706_v52 = vsel %vm301_vm7, %v1703_v51, %v1705_v43  ;;  %v1707_v53 = vsel %vm301_vm7, %v1705_v43, %v1703_v51  ;;  %v1700_v54 = vsel %vm294_vm6, %v1697_v49, %v1699_v48 }
 0x3d3   : > { %2129 = vmatpush1.msk.msra.mxu1 %vm321_vm3, %v1454_v46  ;;  %1526 = vmatprep.mubr.f32.mxu1 %v2216_v6  ;;  %v1710_v58 = vcombine.low %v1706_v52, %v1707_v53  ;;  %v1714_v60 = vcombine.low %v1701_v55, %v1700_v54 }
 0x3d4   : > { %2131 = vmatprep.subr.msk.mxu1 %vm321_vm3, %v2504_v57  ;;  %v1615_v57 = vcombine.high %v1455_v50, %v1455_v50 }
 0x3d5   : > { %v1716_v61 = vsel %vm254_vm8, %v1710_v58, %v1714_v60  ;;  %v1717_v27 = vsel %vm257_vm9, %v1714_v60, %v1710_v58 }
 0x3d6   : > { %v1719_v3 = vcombine.high %v1716_v61, %v1716_v61 }
 0x3da   : > { %2130 = vmatmul.mubr.msk.f32.vlgmr.msra.gmra.mrb[0].mxu1 %vm317_vm4, %v2414_v59  ;;  %v1875_v59 = vcombine.high %v1717_v27, %v1717_v27 }
 0x3db   : > { %2132 = vmatpush1.msk.msra.mxu1 %vm321_vm3, %v2498_v56  ;;  %1605 = vmatprep.mubr.f32.mxu1 %v2216_v6 }
 0x3dc   : > { %2134 = vmatprep.subr.msk.mxu1 %vm321_vm3, %v1615_v57 }
 0x3e2   : > { %2133 = vmatmul.mubr.msk.f32.vlgmr.msra.gmra.mrb[0].mxu1 %vm317_vm4, %v2435_v9 }
 0x3e3   : > { %2135 = vmatpush1.msk.msra.mxu1 %vm321_vm3, %v1455_v50  ;;  %1684 = vmatprep.mubr.f32.mxu1 %v2216_v6 }
 0x3e4   : > { %2137 = vmatprep.subr.msk.mxu1 %vm321_vm3, %v1719_v3 }
 0x3ea   : > { %2136 = vmatmul.mubr.msk.f32.vlgmr.msra.gmra.mrb[0].mxu1 %vm317_vm4, %v2445_v11 }
 0x3eb   : > { %2138 = vmatpush1.msk.msra.mxu1 %vm321_vm3, %v1716_v61  ;;  %1788 = vmatprep.mubr.f32.mxu1 %v2216_v6 }
 0x3ec   : > { %2140 = vmatprep.subr.msk.mxu1 %vm321_vm3, %v2545_v18 }
 0x3f2   : > { %2139 = vmatmul.mubr.msk.f32.vlgmr.msra.gmra.mrb[0].mxu1 %vm317_vm4, %v2458_v13 }
 0x3f3   : > { %2141 = vmatpush1.msk.msra.mxu1 %vm321_vm3, %v2537_v7  ;;  %1865 = vmatprep.mubr.f32.mxu1 %v2216_v6 }
 0x3f4   : > { %2143 = vmatprep.subr.msk.mxu1 %vm321_vm3, %v1875_v59 }
 0x3fa   : > { %2142 = vmatmul.mubr.msk.f32.vlgmr.msra.gmra.mrb[0].mxu1 %vm317_vm4, %v2469_v15 }
 0x3fb   : > { %2144 = vmatpush1.msk.msra.mxu1 %vm321_vm3, %v1717_v27  ;;  %1944 = vmatprep.mubr.f32.mxu1 %v2216_v6 }
 0x402   : > { %2145 = vmatmul.mubr.msk.f32.vlgmr.msra.gmra.mrb[0].mxu1 %vm317_vm4, %v2478_v16 }
 0x4d5   : > { %v1946_v28 = vpop.f32.mrb[0].mxu1 }
 0x4d6   : > { %v1953_v9 = vadd.f32 %v1946_v28, %v2482_v17  ;;  %v1948_v11 = vpop.f32.mrb[1].mxu1 }
 0x4d7   : > { %v1954_v13 = vadd.f32 %v1948_v11, %v2482_v17 }
 0x4d8   : > { %v1959_v56 = vsel %vm321_vm3, %v1953_v9, 0.0  ;;  %v1964_v62 = vmul.f32 %v1953_v9, %v1953_v9 }
 0x4d9   : > { %v1960_v15 = vsel %vm321_vm3, %v1954_v13, 0.0  ;;  %v1965_v63 = vmul.f32 %v1954_v13, %v1954_v13 }
 0x4da   : > { %v1961_v2 = vadd.f32 %v1960_v15, %v1959_v56  ;;  %v1966_v6 = vsel %vm321_vm3, %v1964_v62, 0.0 }
 0x4db   : > { %v1967_v4 = vsel %vm321_vm3, %v1965_v63, 0.0 }
 0x4dc   : > { %1962 = vadd.xlane.f32.xlu0 %v1961_v2  ;;  %v1968_v16 = vadd.f32 %v1967_v4, %v1966_v6 }
 0x4de   : > { %1969 = vadd.xlane.f32.xlu1 %v1968_v16 }
 0x4ef   : > { %1990 = vperm.xlu1 %2200, %v2146_v5  }
 0x4f2   : > { %1983 = vperm.xlu0 %2199, %v2147_v8  }
 0x569   : > { %v1963_v10 = vpop.xlane.xlu0 %1962 }
 0x56a   : > { %v1971_v17 = vmul.f32 0.00390625, %v1963_v10 }
 0x56b   : > { %v1970_v14 = vpop.xlane.xlu1 %1969 }
 0x56c   : > { %v1972_v12 = vmul.f32 %v1971_v17, %v1963_v10  ;;  %v1976_v20 = vsub.f32 %v1953_v9, %v1971_v17  ;;  %v1977_v21 = vsub.f32 %v1954_v13, %v1971_v17 }
 0x56e   : > { %v1973_v7 = vsub.f32 %v1970_v14, %v1972_v12 }
 0x56f   : > { %v1991_v30 = vpop.permute.xlu1 %1990 }
 0x570   : > { %v1974_v18 = vmul.f32 0.003921569, %v1973_v7 }
 0x571   : > { %v1984_v25 = vpop.permute.xlu0 %1983 }
 0x572   : > { %v1975_v19 = vadd.f32 1e-05, %v1974_v18 }
 0x574   : > { %2204 = vrsqrt.f32 %v1975_v19 }
 0x57e   : > { %v2205_v22 = vpop.eup %2204 }
 0x57f   : > { %v1979_v23 = vmul.f32 %v2205_v22, %v1976_v20  ;;  %v1980_v24 = vmul.f32 %v2205_v22, %v1977_v21 }
 0x581   : > { %v1986_v26 = vmul.f32 %v1984_v25, %v1979_v23  ;;  %v1987_v29 = vmul.f32 %v1984_v25, %v1980_v24 }
 0x583   : > { %v1993_v31 = vadd.f32 %v1991_v30, %v1986_v26  ;;  %v1994_v32 = vadd.f32 %v1991_v30, %v1987_v29 }
 0x585   : > { %v1995_v33 = vadd.f32 %v1993_v31, %v2266_v0  ;;  %v1996_v34 = vadd.f32 %v1994_v32, %v2274_v1 }
 0x587   : > { %v1999_v35 = vcombine.low %v1995_v33, %v1996_v34 }
 0x589   : > { %2001 = vst [vmem:[%s244_s28] sm:$0xff] %v1999_v35 }
 0x58a PF: > { %s15_s18 = sadd.s32 1, %s2212_s18  }
 0x58b   : > { %p12_p4 = scmp.ge.s32.totalorder %s15_s18, 4  }
 0x58d   :  { %14 = sbr.rel (!%p12_p4) target bundleno = 1 (0x1), region = 87 }

</bundles_post_ra>
